<compile_context>
chip_gen: v5e
topology: v5e:2x2
jax: 0.10.0
libtpu: 0.0.40
codegen_flags: <defaults>
</compile_context>

<pallas_src>
import functools

import numpy as np

import jax
import jax.numpy as jnp
from jax import lax
from jax.experimental import pallas as pl
from jax.experimental.pallas import tpu as pltpu


def _block_kernel(x_ref, wb1_ref, wb2_ref, aff_ref, out_ref, *, H):
    # x_ref   : (Bb*H, 3*W*Cin)     bf16  conv1 LHS (3 vertical taps, lane-concat)
    # wb1_ref : (3*W*Cin, 2*W*Cout) bf16  conv1 banded taps; 1x1 shortcut fused
    #                                     into the dy=1 band as extra out columns
    # wb2_ref : (3*W*Cout, W*Cout)  bf16  conv2 banded taps
    # aff_ref : (6, W*Cout)         f32   rows = s1, b1, ss, bs, s2, b2
    # out_ref : (Bb*H, W*Cout)      bf16  lane-dense output slab
    M, WCout = out_ref.shape

    # --- conv1 (3x3) + fused 1x1 shortcut: ONE MXU matmul, f32 accumulate ---
    acc = jnp.dot(x_ref[...], wb1_ref[...], preferred_element_type=jnp.float32)
    conv1 = acc[:, :WCout]                      # conv1 pre-BN
    short = acc[:, WCout:]                      # 1x1 shortcut pre-BN

    aff = aff_ref[...]
    s1, b1 = aff[0:1, :], aff[1:2, :]
    ss, bs = aff[2:3, :], aff[3:4, :]
    s2, b2 = aff[4:5, :], aff[5:6, :]

    out1 = jnp.maximum(conv1 * s1 + b1, 0.0)    # BN1 + ReLU   (f32 epilogue)
    res = short * ss + bs                       # shortcut BN  (f32 epilogue)

    # --- conv2 (3x3): build the 3-vertical-tap LHS in registers -------------
    # Row r of the slab is image (r // H), image-row (r % H).  roll(+1) gives
    # the row above, roll(M-1) (== roll(-1)) the row below.  Rows that would
    # cross an image boundary (or the circular wrap) are masked to zero, which
    # is exactly the conv's 'SAME' vertical zero padding.
    h = lax.broadcasted_iota(jnp.int32, (M, 1), 0) % H
    prev_row = pltpu.roll(out1, shift=1, axis=0)       # input row h-1  (dy=0)
    next_row = pltpu.roll(out1, shift=M - 1, axis=0)   # input row h+1  (dy=2)
    prev_row = jnp.where(h == 0, 0.0, prev_row)
    next_row = jnp.where(h == H - 1, 0.0, next_row)

    lhs2 = jnp.concatenate([prev_row.astype(jnp.bfloat16),
                            out1.astype(jnp.bfloat16),
                            next_row.astype(jnp.bfloat16)], axis=1)

    acc2 = jnp.dot(lhs2, wb2_ref[...], preferred_element_type=jnp.float32)
    out2 = acc2 * s2 + b2                              # BN2 (f32)

    out_ref[...] = jnp.maximum(out2 + res, 0.0).astype(out_ref.dtype)


def _banded_taps(w_hwio, W):
    """(3,3,Ci,Co) conv weight -> (3, W*Ci, W*Co) block-banded tap slabs.

    For each dy: out_row(h) = in_row(h-1+dy) @ slab[dy], summed over dy, where
    in_row(-1)/in_row(H) are zero.  Horizontal taps and the horizontal 'SAME'
    zero padding are folded into the band structure.  Host-side, one-time.
    """
    kh, kw, Ci, Co = w_hwio.shape
    w_np = np.asarray(w_hwio, np.float32)
    band = np.zeros((kh, W * Ci, W * Co), np.float32)
    for dy in range(kh):
        for dx in range(kw):
            for wo in range(W):
                wi = wo + dx - 1
                if 0 <= wi < W:
                    band[dy, wi * Ci:(wi + 1) * Ci,
                         wo * Co:(wo + 1) * Co] = w_np[dy, dx]
    return band


def _conv1_plus_shortcut_taps(w1, ws, W):
    """Fuse the 1x1 shortcut into conv1's dy=1 band as extra output columns."""
    _, _, Ci, Co = w1.shape
    band = _banded_taps(w1, W)                          # (3, W*Ci, W*Co)
    sband = np.zeros_like(band)
    ws_np = np.asarray(ws, np.float32).reshape(Ci, Co)
    for wo in range(W):
        sband[1, wo * Ci:(wo + 1) * Ci, wo * Co:(wo + 1) * Co] = ws_np
    return np.concatenate([band, sband], axis=2)        # (3, W*Ci, 2*W*Co)


def block_forward(x_nchw, params, *, max_bb=8):
    """Block forward pass. x_nchw: (B, Cin, H, W) f32 -> (B, Cout, H, W) f32."""
    B, Cin, H, W = x_nchw.shape
    Cout = params["w1"].shape[-1]
    WCin, WCout = W * Cin, W * Cout
    # TODO(synk): general H via row padding; sublane tiling wants H % 8 == 0.
    assert H % 8 == 0, "H must be a multiple of 8"

    # images per grid step: largest divisor of B that is <= max_bb
    bb = max(d for d in range(1, min(B, max_bb) + 1) if B % d == 0)

    # --- single prep pass (XLA fuses): NCHW -> channels-last lane-dense slab,
    #     vertical 'SAME' pad, 3 vertical taps lane-concatenated, bf16. -------
    x_cl = jnp.transpose(x_nchw, (0, 2, 3, 1)).reshape(B, H, WCin)
    xpad = jnp.pad(x_cl, ((0, 0), (1, 1), (0, 0)))
    x_lhs = jnp.concatenate(
        [xpad[:, 0:H, :], xpad[:, 1:H + 1, :], xpad[:, 2:H + 2, :]], axis=-1)
    x_lhs = x_lhs.reshape(B * H, 3 * WCin).astype(jnp.bfloat16)
    # TODO(synk): callers that already have NHWC / pre-packed activations
    #             should pass them directly and skip this transpose pass.

    # host-side one-time packing of weights into banded bf16 slabs
    wb1 = jnp.asarray(
        _conv1_plus_shortcut_taps(params["w1"], params["ws"], W)
        .reshape(3 * WCin, 2 * WCout), dtype=jnp.bfloat16)
    wb2 = jnp.asarray(
        _banded_taps(params["w2"], W).reshape(3 * WCout, WCout),
        dtype=jnp.bfloat16)

    # folded BN affines, tiled across W so they broadcast over the lane slab
    aff = jnp.stack([jnp.tile(params["s1"], W), jnp.tile(params["b1"], W),
                     jnp.tile(params["ss"], W), jnp.tile(params["bs"], W),
                     jnp.tile(params["s2"], W), jnp.tile(params["b2"], W)],
                    axis=0).astype(jnp.float32)         # (6, WCout)

    kernel = functools.partial(_block_kernel, H=H)

    out2d = pl.pallas_call(
        kernel,
        out_shape=jax.ShapeDtypeStruct((B * H, WCout), jnp.bfloat16),
        grid=(B // bb,),
        in_specs=[
            pl.BlockSpec((bb * H, 3 * WCin), lambda g: (g, 0)),
            # weights / affines: whole-array resident in VMEM (no per-step
            # DMA, no double-buffering)
            pl.BlockSpec(memory_space=pltpu.MemorySpace.VMEM),
            pl.BlockSpec(memory_space=pltpu.MemorySpace.VMEM),
            pl.BlockSpec(memory_space=pltpu.MemorySpace.VMEM),
        ],
        out_specs=pl.BlockSpec((bb * H, WCout), lambda g: (g, 0)),
        compiler_params=pltpu.CompilerParams(
            dimension_semantics=("parallel",),
            vmem_limit_bytes=32 * 1024 * 1024),
    )(x_lhs, wb1, wb2, aff)

    out = out2d.reshape(B, H, W, Cout)
    return jnp.transpose(out, (0, 3, 1, 2)).astype(jnp.float32)   # NCHW f32


def make_params(key, cin, cout, eps=1e-5):
    """Deterministic synthetic parameters; BN (+conv bias) folded to scale/bias."""
    ks = jax.random.split(key, 12)

    def bn_fold(gamma, beta, mean, var, conv_bias):
        scale = gamma / jnp.sqrt(var + eps)
        bias = beta + scale * (conv_bias - mean)
        return scale, bias

    # conv1: Cin -> Cout, 3x3, with bias; BN1
    w1 = 0.1 * jax.random.normal(ks[0], (3, 3, cin, cout), jnp.float32)
    b1c = 0.05 * jax.random.normal(ks[1], (cout,), jnp.float32)
    g1 = 1.0 + 0.1 * jax.random.normal(ks[2], (cout,), jnp.float32)
    be1 = 0.1 * jax.random.normal(ks[3], (cout,), jnp.float32)
    m1 = 0.05 * jnp.arange(cout, dtype=jnp.float32)
    v1 = 1.0 + 0.02 * jnp.arange(cout, dtype=jnp.float32)
    s1, b1 = bn_fold(g1, be1, m1, v1, b1c)

    # conv2: Cout -> Cout, 3x3, with bias; BN2
    w2 = 0.1 * jax.random.normal(ks[4], (3, 3, cout, cout), jnp.float32)
    b2c = 0.05 * jax.random.normal(ks[5], (cout,), jnp.float32)
    g2 = 1.0 + 0.1 * jax.random.normal(ks[6], (cout,), jnp.float32)
    be2 = 0.1 * jax.random.normal(ks[7], (cout,), jnp.float32)
    m2 = 0.03 * jnp.arange(cout, dtype=jnp.float32)
    v2 = 1.0 + 0.01 * jnp.arange(cout, dtype=jnp.float32)
    s2, b2 = bn_fold(g2, be2, m2, v2, b2c)

    # shortcut: Cin -> Cout, 1x1, with bias; BN_s
    ws = 0.1 * jax.random.normal(ks[8], (1, 1, cin, cout), jnp.float32)
    bsc = 0.05 * jax.random.normal(ks[9], (cout,), jnp.float32)
    gs = 1.0 + 0.1 * jax.random.normal(ks[10], (cout,), jnp.float32)
    bes = 0.1 * jax.random.normal(ks[11], (cout,), jnp.float32)
    ms = 0.02 * jnp.arange(cout, dtype=jnp.float32)
    vs = 1.0 + 0.03 * jnp.arange(cout, dtype=jnp.float32)
    ss, bs = bn_fold(gs, bes, ms, vs, bsc)

    return dict(w1=w1, s1=s1, b1=b1, w2=w2, s2=s2, b2=b2,
                ws=ws, ss=ss, bs=bs)


def _ref_block(x_nchw, params, cast_bf16=False):
    """Pure-JAX reference (lax conv) of the folded-BN block, NCHW in/out.

    cast_bf16=True mimics the kernel's bf16-operand / f32-accumulate recipe
    (including the bf16 final output).
    """
    def cast(a):
        if cast_bf16:
            return a.astype(jnp.bfloat16).astype(jnp.float32)
        return a

    x = jnp.transpose(x_nchw, (0, 2, 3, 1)).astype(jnp.float32)
    dn = ("NHWC", "HWIO", "NHWC")

    c1 = lax.conv_general_dilated(cast(x), cast(params["w1"]), (1, 1), "SAME",
                                  dimension_numbers=dn)
    o = jnp.maximum(c1 * params["s1"] + params["b1"], 0.0)
    c2 = lax.conv_general_dilated(cast(o), cast(params["w2"]), (1, 1), "SAME",
                                  dimension_numbers=dn)
    o2 = c2 * params["s2"] + params["b2"]
    sc = lax.conv_general_dilated(cast(x), cast(params["ws"]), (1, 1), "SAME",
                                  dimension_numbers=dn)
    sc = sc * params["ss"] + params["bs"]
    out = jnp.maximum(o2 + sc, 0.0)
    if cast_bf16:
        out = out.astype(jnp.bfloat16).astype(jnp.float32)
    return jnp.transpose(out, (0, 3, 1, 2))


if __name__ == "__main__":
    key = jax.random.PRNGKey(0)
    kx, kp = jax.random.split(key)

    B, Cin, Cout, H, W = 2, 4, 8, 16, 16
    x = jax.random.normal(kx, (B, Cin, H, W), jnp.float32)
    params = make_params(kp, Cin, Cout)

    out = jax.block_until_ready(block_forward(x, params))
    assert out.shape == (B, Cout, H, W)

    # tight check against a reference using the same bf16-operand / bf16-output
    # recipe (tolerance covers reduction-order + one bf16 ulp)
    ref_bf16 = jax.block_until_ready(_ref_block(x, params, cast_bf16=True))
    assert jnp.allclose(out, ref_bf16, rtol=1e-2, atol=1e-2), (
        float(jnp.max(jnp.abs(out - ref_bf16))))

    # loose check against exact f32 module semantics (bf16 rounding tolerance)
    ref_f32 = jax.block_until_ready(_ref_block(x, params, cast_bf16=False))
    assert jnp.allclose(out, ref_f32, rtol=8e-2, atol=8e-2), (
        float(jnp.max(jnp.abs(out - ref_f32))))

    print("KERNEL_OK")
</pallas_src>

<mosaic_0001>
module attributes {stable_mosaic.version = 11 : i64} {
  func.func @_block_kernel(%arg0: i32, %arg1: memref<32x192xbf16, #tpu.memory_space<vmem>>, %arg2: memref<192x256xbf16, #tpu.memory_space<vmem>>, %arg3: memref<384x128xbf16, #tpu.memory_space<vmem>>, %arg4: memref<6x128xf32, #tpu.memory_space<vmem>>, %arg5: memref<32x128xbf16, #tpu.memory_space<vmem>>) attributes {dimension_semantics = [#tpu.dimension_semantics<parallel>], iteration_bounds = array<i64: 1>, scalar_prefetch = 0 : i64, scratch_operands = 0 : i64, tpu.core_type = #tpu.core_type<tc>, window_params = [{transform_indices = @transform_0, window_bounds = array<i64: 32, 192>}, {pipeline_mode = #tpu.pipeline_mode<synchronous>, transform_indices = @transform_1, window_bounds = array<i64: 192, 256>}, {pipeline_mode = #tpu.pipeline_mode<synchronous>, transform_indices = @transform_2, window_bounds = array<i64: 384, 128>}, {pipeline_mode = #tpu.pipeline_mode<synchronous>, transform_indices = @transform_3, window_bounds = array<i64: 6, 128>}, {transform_indices = @transform_4, window_bounds = array<i64: 32, 128>}]} {
    %c0 = arith.constant 0 : index
    %c0_0 = arith.constant 0 : index
    %0 = vector.load %arg1[%c0, %c0_0] : memref<32x192xbf16, #tpu.memory_space<vmem>>, vector<32x192xbf16>
    %c0_1 = arith.constant 0 : index
    %c0_2 = arith.constant 0 : index
    %1 = vector.load %arg2[%c0_1, %c0_2] : memref<192x256xbf16, #tpu.memory_space<vmem>>, vector<192x256xbf16>
    %cst = arith.constant dense<0.000000e+00> : vector<32x256xf32>
    %2 = tpu.matmul %0, %1, %cst {dimension_numbers = #tpu.dot_dimension_numbers<[1], [0], [0], [1], [0, 0, 1, 1], [], []>} : vector<32x192xbf16>, vector<192x256xbf16>, vector<32x256xf32> -> vector<32x256xf32>
    %3 = vector.extract_strided_slice %2 {offsets = [0, 0], sizes = [32, 128], strides = [1, 1]} : vector<32x256xf32> to vector<32x128xf32>
    %4 = vector.extract_strided_slice %2 {offsets = [0, 128], sizes = [32, 128], strides = [1, 1]} : vector<32x256xf32> to vector<32x128xf32>
    %c0_3 = arith.constant 0 : index
    %c0_4 = arith.constant 0 : index
    %5 = vector.load %arg4[%c0_3, %c0_4] : memref<6x128xf32, #tpu.memory_space<vmem>>, vector<6x128xf32>
    %6 = vector.extract_strided_slice %5 {offsets = [0, 0], sizes = [1, 128], strides = [1, 1]} : vector<6x128xf32> to vector<1x128xf32>
    %7 = vector.extract_strided_slice %5 {offsets = [1, 0], sizes = [1, 128], strides = [1, 1]} : vector<6x128xf32> to vector<1x128xf32>
    %8 = vector.extract_strided_slice %5 {offsets = [2, 0], sizes = [1, 128], strides = [1, 1]} : vector<6x128xf32> to vector<1x128xf32>
    %9 = vector.extract_strided_slice %5 {offsets = [3, 0], sizes = [1, 128], strides = [1, 1]} : vector<6x128xf32> to vector<1x128xf32>
    %10 = vector.extract_strided_slice %5 {offsets = [4, 0], sizes = [1, 128], strides = [1, 1]} : vector<6x128xf32> to vector<1x128xf32>
    %11 = vector.extract_strided_slice %5 {offsets = [5, 0], sizes = [1, 128], strides = [1, 1]} : vector<6x128xf32> to vector<1x128xf32>
    %12 = vector.broadcast %6 : vector<1x128xf32> to vector<32x128xf32>
    %13 = arith.mulf %3, %12 : vector<32x128xf32>
    %14 = vector.broadcast %7 : vector<1x128xf32> to vector<32x128xf32>
    %15 = arith.addf %13, %14 : vector<32x128xf32>
    %cst_5 = arith.constant 0.000000e+00 : f32
    %16 = vector.broadcast %cst_5 : f32 to vector<32x128xf32>
    %17 = arith.maximumf %15, %16 : vector<32x128xf32>
    %18 = vector.broadcast %8 : vector<1x128xf32> to vector<32x128xf32>
    %19 = arith.mulf %4, %18 : vector<32x128xf32>
    %20 = vector.broadcast %9 : vector<1x128xf32> to vector<32x128xf32>
    %21 = arith.addf %19, %20 : vector<32x128xf32>
    %22 = tpu.iota {dimensions = array<i32: 0>} : vector<32x1xi32>
    %c16_i32 = arith.constant 16 : i32
    %c0_i32 = arith.constant 0 : i32
    %23 = arith.cmpi eq, %c16_i32, %c0_i32 : i32
    %c1_i32 = arith.constant 1 : i32
    %24 = arith.select %23, %c1_i32, %c16_i32 : i32
    %25 = vector.broadcast %24 : i32 to vector<32x1xi32>
    %26 = arith.remsi %22, %25 : vector<32x1xi32>
    %c0_i32_6 = arith.constant 0 : i32
    %27 = vector.broadcast %c0_i32_6 : i32 to vector<32x1xi32>
    %28 = arith.cmpi ne, %26, %27 : vector<32x1xi32>
    %c0_i32_7 = arith.constant 0 : i32
    %29 = vector.broadcast %c0_i32_7 : i32 to vector<32x1xi32>
    %30 = arith.cmpi slt, %26, %29 : vector<32x1xi32>
    %c0_i32_8 = arith.constant 0 : i32
    %31 = arith.cmpi slt, %24, %c0_i32_8 : i32
    %32 = vector.broadcast %31 : i1 to vector<32x1xi1>
    %33 = vector.broadcast %32 : vector<32x1xi1> to vector<32x1xi1>
    %34 = arith.xori %30, %33 : vector<32x1xi1>
    %35 = arith.andi %34, %28 : vector<32x1xi1>
    %36 = vector.broadcast %24 : i32 to vector<32x1xi32>
    %37 = arith.addi %26, %36 : vector<32x1xi32>
    %38 = arith.select %35, %37, %26 : vector<32x1xi1>, vector<32x1xi32>
    %c1_i32_9 = arith.constant 1 : i32
    %39 = tpu.dynamic_rotate %17 by %c1_i32_9 dim 0 : vector<32x128xf32>, i32 -> vector<32x128xf32>
    %c31_i32 = arith.constant 31 : i32
    %40 = tpu.dynamic_rotate %17 by %c31_i32 dim 0 : vector<32x128xf32>, i32 -> vector<32x128xf32>
    %c0_i32_10 = arith.constant 0 : i32
    %41 = vector.broadcast %c0_i32_10 : i32 to vector<32x1xi32>
    %42 = arith.cmpi eq, %38, %41 : vector<32x1xi32>
    %cst_11 = arith.constant 0.000000e+00 : f32
    %43 = vector.shape_cast %42 : vector<32x1xi1> to vector<32x1xi1>
    %44 = vector.broadcast %43 : vector<32x1xi1> to vector<32x128xi1>
    %45 = vector.broadcast %cst_11 : f32 to vector<32x128xf32>
    %46 = arith.select %44, %45, %39 : vector<32x128xi1>, vector<32x128xf32>
    %c15_i32 = arith.constant 15 : i32
    %47 = vector.broadcast %c15_i32 : i32 to vector<32x1xi32>
    %48 = arith.cmpi eq, %38, %47 : vector<32x1xi32>
    %cst_12 = arith.constant 0.000000e+00 : f32
    %49 = vector.shape_cast %48 : vector<32x1xi1> to vector<32x1xi1>
    %50 = vector.broadcast %49 : vector<32x1xi1> to vector<32x128xi1>
    %51 = vector.broadcast %cst_12 : f32 to vector<32x128xf32>
    %52 = arith.select %50, %51, %40 : vector<32x128xi1>, vector<32x128xf32>
    %53 = arith.truncf %46 : vector<32x128xf32> to vector<32x128xbf16>
    %54 = arith.truncf %17 : vector<32x128xf32> to vector<32x128xbf16>
    %55 = arith.truncf %52 : vector<32x128xf32> to vector<32x128xbf16>
    %56 = tpu.concatenate %53, %54, %55 in 1 : vector<32x128xbf16>, vector<32x128xbf16>, vector<32x128xbf16> -> vector<32x384xbf16>
    %c0_13 = arith.constant 0 : index
    %c0_14 = arith.constant 0 : index
    %57 = vector.load %arg3[%c0_13, %c0_14] : memref<384x128xbf16, #tpu.memory_space<vmem>>, vector<384x128xbf16>
    %cst_15 = arith.constant dense<0.000000e+00> : vector<32x128xf32>
    %58 = tpu.matmul %56, %57, %cst_15 {dimension_numbers = #tpu.dot_dimension_numbers<[1], [0], [0], [1], [0, 0, 1, 1], [], []>} : vector<32x384xbf16>, vector<384x128xbf16>, vector<32x128xf32> -> vector<32x128xf32>
    %59 = vector.broadcast %10 : vector<1x128xf32> to vector<32x128xf32>
    %60 = arith.mulf %58, %59 : vector<32x128xf32>
    %61 = vector.broadcast %11 : vector<1x128xf32> to vector<32x128xf32>
    %62 = arith.addf %60, %61 : vector<32x128xf32>
    %63 = arith.addf %62, %21 : vector<32x128xf32>
    %cst_16 = arith.constant 0.000000e+00 : f32
    %64 = vector.broadcast %cst_16 : f32 to vector<32x128xf32>
    %65 = arith.maximumf %63, %64 : vector<32x128xf32>
    %66 = arith.truncf %65 : vector<32x128xf32> to vector<32x128xbf16>
    %c0_17 = arith.constant 0 : index
    %c0_18 = arith.constant 0 : index
    %67 = vector.load %arg5[%c0_17, %c0_18] : memref<32x128xbf16, #tpu.memory_space<vmem>>, vector<32x128xbf16>
    tpu.vector_store %arg5[%c0_17, %c0_18], %66 {strides = array<i32>} : memref<32x128xbf16, #tpu.memory_space<vmem>>, vector<32x128xbf16>,
    return
  }
  func.func @transform_0(%arg0: i32) -> (i32, i32) {
    %c0_i32 = arith.constant 0 : i32
    %c0_i32_0 = arith.constant 0 : i32
    return %arg0, %c0_i32 : i32, i32
  }
  func.func @transform_1(%arg0: i32) -> (i32, i32) {
    %c0_i32 = arith.constant 0 : i32
    %c0_i32_0 = arith.constant 0 : i32
    %c0_i32_1 = arith.constant 0 : i32
    return %c0_i32, %c0_i32_0 : i32, i32
  }
  func.func @transform_2(%arg0: i32) -> (i32, i32) {
    %c0_i32 = arith.constant 0 : i32
    %c0_i32_0 = arith.constant 0 : i32
    %c0_i32_1 = arith.constant 0 : i32
    return %c0_i32, %c0_i32_0 : i32, i32
  }
  func.func @transform_3(%arg0: i32) -> (i32, i32) {
    %c0_i32 = arith.constant 0 : i32
    %c0_i32_0 = arith.constant 0 : i32
    %c0_i32_1 = arith.constant 0 : i32
    return %c0_i32, %c0_i32_0 : i32, i32
  }
  func.func @transform_4(%arg0: i32) -> (i32, i32) {
    %c0_i32 = arith.constant 0 : i32
    %c0_i32_0 = arith.constant 0 : i32
    return %arg0, %c0_i32 : i32, i32
  }
}

</mosaic_0001>

<bundles_post_ra>
// kernel: tpu_custom_call.1
= control target key start
LH: loop header
LB: loop body
LE: loop exit
PB: predicated region body
PF: predicated region fallthrough
CT: control target
= control target key end

     0   :  { %9 = vsyncpa [#allocation3], 0  ;;  %s1322_s0 = inlined_call_operand.hbm [shape: bf16[32,192], index: 0, kind: input, shape index: {}]   ;;  %s1323_s1 = inlined_call_operand.hbm [shape: bf16[192,256], index: 1, kind: input, shape index: {}]   ;;  %s1324_s2 = inlined_call_operand.hbm [shape: bf16[384,128], index: 2, kind: input, shape index: {}]   ;;  %s1325_s3 = inlined_call_operand.hbm [shape: f32[6,128], index: 3, kind: input, shape index: {}]   ;;  %s1326_s4 = inlined_call_operand.hbm [shape: bf16[32,128], index: 4, kind: output, shape index: {}]  }
   0x1   :  { %10 = vsyncpa [#allocation6], 0 }
   0x2   :  { %11 = vsyncpa [#allocation9], 0 }
   0x3   :  { %12 = vsyncpa [#allocation4], 0  ;;  %s30_s17 = sshll.u32 %s1323_s1, 4  ;;  %s1221_s18 = smov [#allocation5]   ;;  %s31_s17 = int_to_ptr.hbm [resolvable:$true] %s30_s17 }
   0x4   :  { %s32_s19 = sshll.u32 %s1221_s18, 4  ;;  %s17_s22 = sshll.u32 %s1322_s0, 4  ;;  %s33_s19 = int_to_ptr.vmem [resolvable:$true] %s32_s19  ;;  %s18_s22 = int_to_ptr.hbm [resolvable:$true] %s17_s22 }
   0x5   :  { %s1222_s23 = smov 128   ;;  %s1223_s24 = smov 8  }
   0x6   :  { %38 = dma.hbm_to_vmem [thread:$0]  %s31_s17, 3072, %s33_s19, [#allocation6], %s1222_s23, %s1222_s23, %s1223_s24  }
   0x7   :  { %s1224_s25 = smov [#allocation2]   ;;  %s43_s29 = sshll.u32 %s1324_s2, 4  ;;  %s44_s29 = int_to_ptr.hbm [resolvable:$true] %s43_s29 }
   0x8   :  { %s19_s26 = sshll.u32 %s1224_s25, 4  ;;  %s1225_s1 = smov [#allocation7]   ;;  %s20_s26 = int_to_ptr.vmem [resolvable:$true] %s19_s26 }
   0x9   :  { %25 = dma.hbm_to_vmem [thread:$0]  %s18_s22, 512, %s20_s26, [#allocation3], %s1222_s23, %s1222_s23, %s1223_s24  }
   0xa   :  { %s45_s30 = sshll.u32 %s1225_s1, 4  ;;  %s57_s0 = sshll.u32 %s1325_s3, 4  ;;  %s46_s30 = int_to_ptr.vmem [resolvable:$true] %s45_s30  ;;  %s58_s0 = int_to_ptr.hbm [resolvable:$true] %s57_s0 }
   0xb   :  { %s1226_s7 = smov 64   ;;  %s1227_s8 = smov 4  }
   0xc   :  { %51 = dma.hbm_to_vmem [thread:$0]  %s44_s29, 3072, %s46_s30, [#allocation6], %s1226_s7, %s1226_s7, %s1227_s8  }
   0xd   :  { %s1228_s9 = smov [#allocation8]  }
   0xe   :  { %s59_s10 = sshll.u32 %s1228_s9, 4  ;;  %s60_s10 = int_to_ptr.vmem [resolvable:$true] %s59_s10 }
   0xf   :  { %62 = dma.hbm_to_vmem [thread:$0]  %s58_s0, 128, %s60_s10, [#allocation9]  }
  0x10   :  { %1213 = dma.done.wait [#allocation3], 512  }
  0x11   :  { %1214 = vsyncadd [#allocation3], 4294966784 }
  0x12   :  { %1215 = dma.done.wait [#allocation6], 6144  }
  0x13   :  { %1216 = vsyncadd [#allocation6], 4294961152 }
  0x14   :  { %1217 = dma.done.wait [#allocation9], 128  }
  0x15   :  { %1218 = vsyncadd [#allocation9], 4294967168  ;;  %v875_v0 = vld [vmem:[#allocation5 + $0x70] sm:$0xf]  ;;  %v1032_v1 = vld [vmem:[#allocation5 + $0x74] sm:$0xf0] }
  0x16   :  { %v867_v2 = vld [vmem:[#allocation5 + $0x60] sm:$0xf]  ;;  %v876_v3 = vor.u32 %v1032_v1, %v875_v0  ;;  %v1030_v4 = vld [vmem:[#allocation5 + $0x64] sm:$0xf0]  ;;  %v907_v5 = vld [vmem:[#allocation5 + $0xb0] sm:$0xf] }
  0x17   :  { %v1040_v6 = vld [vmem:[#allocation5 + $0xb4] sm:$0xf0]  ;;  %v868_v7 = vor.u32 %v1030_v4, %v867_v2  ;;  %v899_v9 = vld [vmem:[#allocation5 + $0xa0] sm:$0xf]  ;;  %v1038_v10 = vld [vmem:[#allocation5 + $0xa4] sm:$0xf0] }
  0x18   :  { %253 = vmatpush.bf16.msra.mxu0 %v876_v3  ;;  %v908_v8 = vor.u32 %v1040_v6, %v907_v5  ;;  %v859_v11 = vld [vmem:[#allocation5 + $0x50] sm:$0xf]  ;;  %v1028_v12 = vld [vmem:[#allocation5 + $0x54] sm:$0xf0]  ;;  %v900_v13 = vor.u32 %v1038_v10, %v899_v9  ;;  %v851_v17 = vld [vmem:[#allocation5 + $0x40] sm:$0xf] }
  0x19   :  { %v891_v14 = vld [vmem:[#allocation5 + $0x90] sm:$0xf]  ;;  %v1036_v15 = vld [vmem:[#allocation5 + $0x94] sm:$0xf0]  ;;  %v860_v16 = vor.u32 %v1028_v12, %v859_v11  ;;  %v1026_v18 = vld [vmem:[#allocation5 + $0x44] sm:$0xf0] }
  0x1a   :  { %276 = vmatpush.bf16.msra.mxu1 %v908_v8  ;;  %v892_v19 = vor.u32 %v1036_v15, %v891_v14  ;;  %v883_v20 = vld [vmem:[#allocation5 + $0x80] sm:$0xf]  ;;  %v1034_v21 = vld [vmem:[#allocation5 + $0x84] sm:$0xf0]  ;;  %v852_v22 = vor.u32 %v1026_v18, %v851_v17  ;;  %v843_v23 = vld [vmem:[#allocation5 + $0x30] sm:$0xf] }
  0x1b   :  { %v1024_v24 = vld [vmem:[#allocation5 + $0x34] sm:$0xf0]  ;;  %v884_v25 = vor.u32 %v1034_v21, %v883_v20  ;;  %v1013_v26 = vld [vmem:[#allocation2 + $0x4] sm:$0xf]  ;;  %v805_v27 = vld [vmem:[#allocation2 + $0x8] sm:$0xf0] }
  0x1c   :  { %254 = vmatpush.bf16.msra.mxu0 %v868_v7  ;;  %v844_v28 = vor.u32 %v1024_v24, %v843_v23  ;;  %v835_v29 = vld [vmem:[#allocation5 + $0x20] sm:$0xf]  ;;  %v1022_v30 = vld [vmem:[#allocation5 + $0x24] sm:$0xf0]  ;;  %v1270_v31 = vor.u32 %v1013_v26, %v805_v27  ;;  %vm246_vm0 = vcmask 523264   ;;  %v1056_v17 = vld [vmem:[#allocation7 + $0x78] sm:$0xff] }
  0x1d   :  { %v1031_v32 = vld [vmem:[#allocation5 + $0x74] sm:$0xf]  ;;  %v877_v33 = vld [vmem:[#allocation5 + $0x78] sm:$0xf0]  ;;  %v1029_v34 = vld [vmem:[#allocation5 + $0x64] sm:$0xf]  ;;  %v836_v35 = vor.u32 %v1022_v30, %v835_v29 }
  0x1e   :  { %277 = vmatpush.bf16.msra.mxu1 %v900_v13  ;;  %v827_v36 = vld [vmem:[#allocation5 + $0x10] sm:$0xf]  ;;  %v880_v37 = vor.u32 %v1031_v32, %v877_v33  ;;  %v869_v38 = vld [vmem:[#allocation5 + $0x68] sm:$0xf0]  ;;  %v1020_v39 = vld [vmem:[#allocation5 + $0x14] sm:$0xf0] }
  0x1f   :  { %v1039_v40 = vld [vmem:[#allocation5 + $0xb4] sm:$0xf]  ;;  %v909_v41 = vld [vmem:[#allocation5 + $0xb8] sm:$0xf0]  ;;  %v872_v42 = vor.u32 %v1029_v34, %v869_v38  ;;  %v1037_v44 = vld [vmem:[#allocation5 + $0xa4] sm:$0xf]  ;;  %v828_v48 = vor.u32 %v1020_v39, %v827_v36 }
  0x20   :  { %255 = vmatpush.bf16.msra.mxu0 %v860_v16  ;;  %291 = vmatpush.bf16.msra.mxu2 %v880_v37  ;;  %v912_v43 = vor.u32 %v1039_v40, %v909_v41  ;;  %v901_v45 = vld [vmem:[#allocation5 + $0xa8] sm:$0xf0]  ;;  %v1027_v46 = vld [vmem:[#allocation5 + $0x54] sm:$0xf]  ;;  %v861_v47 = vld [vmem:[#allocation5 + $0x58] sm:$0xf0] }
  0x21   :  { %v819_v49 = vld [vmem:[#allocation5] sm:$0xf]  ;;  %v904_v50 = vor.u32 %v1037_v44, %v901_v45  ;;  %v1018_v51 = vld [vmem:[#allocation5 + $0x4] sm:$0xf0]  ;;  %v1035_v52 = vld [vmem:[#allocation5 + $0x94] sm:$0xf]  ;;  %v864_v54 = vor.u32 %v1027_v46, %v861_v47 }
  0x22   :  { %278 = vmatpush.bf16.msra.mxu1 %v892_v19  ;;  %314 = vmatpush.bf16.msra.mxu3 %v912_v43  ;;  %v893_v53 = vld [vmem:[#allocation5 + $0x98] sm:$0xf0]  ;;  %v1025_v55 = vld [vmem:[#allocation5 + $0x44] sm:$0xf]  ;;  %v853_v56 = vld [vmem:[#allocation5 + $0x48] sm:$0xf0]  ;;  %v820_v57 = vor.u32 %v1018_v51, %v819_v49 }
  0x23   :  { %v803_v58 = vld [vmem:[#allocation2] sm:$0xf]  ;;  %v1014_v59 = vld [vmem:[#allocation2 + $0x4] sm:$0xf0]  ;;  %v896_v60 = vor.u32 %v1035_v52, %v893_v53  ;;  %v1033_v61 = vld [vmem:[#allocation5 + $0x84] sm:$0xf]  ;;  %v856_v1 = vor.u32 %v1025_v55, %v853_v56 }
  0x24   :  { %256 = vmatpush.bf16.msra.mxu0 %v852_v22  ;;  %292 = vmatpush.bf16.msra.mxu2 %v872_v42  ;;  %v885_v62 = vld [vmem:[#allocation5 + $0x88] sm:$0xf0]  ;;  %v1015_v63 = vld [vmem:[#allocation2 + $0x14] sm:$0xf]  ;;  %v813_v0 = vld [vmem:[#allocation2 + $0x18] sm:$0xf0]  ;;  %v804_v2 = vor.u32 %v1014_v59, %v803_v58 }
  0x25   :  { %v1023_v3 = vld [vmem:[#allocation5 + $0x34] sm:$0xf]  ;;  %v845_v4 = vld [vmem:[#allocation5 + $0x38] sm:$0xf0]  ;;  %v888_v5 = vor.u32 %v1033_v61, %v885_v62  ;;  %v816_v6 = vor.u32 %v1015_v63, %v813_v0  ;;  %v1021_v8 = vld [vmem:[#allocation5 + $0x24] sm:$0xf] }
  0x26   :  { %279 = vmatpush.bf16.msra.mxu1 %v884_v25  ;;  %315 = vmatpush.bf16.msra.mxu3 %v904_v50  ;;  %v848_v7 = vor.u32 %v1023_v3, %v845_v4  ;;  %v837_v9 = vld [vmem:[#allocation5 + $0x28] sm:$0xf0]  ;;  %v1019_v11 = vld [vmem:[#allocation5 + $0x14] sm:$0xf]  ;;  %v829_v12 = vld [vmem:[#allocation5 + $0x18] sm:$0xf0] }
  0x27   :  { %v840_v10 = vor.u32 %v1021_v8, %v837_v9  ;;  %v832_v13 = vor.u32 %v1019_v11, %v829_v12  ;;  %v811_v14 = vld [vmem:[#allocation2 + $0x10] sm:$0xf]  ;;  %v1016_v15 = vld [vmem:[#allocation2 + $0x14] sm:$0xf0]  ;;  %v1017_v18 = vld [vmem:[#allocation5 + $0x4] sm:$0xf] }
  0x28   :  { %257 = vmatpush.bf16.msra.mxu0 %v844_v28  ;;  %293 = vmatpush.bf16.msra.mxu2 %v864_v54  ;;  %v812_v16 = vor.u32 %v1016_v15, %v811_v14  ;;  %v821_v19 = vld [vmem:[#allocation5 + $0x8] sm:$0xf0]  ;;  %v1055_v21 = vld [vmem:[#allocation7 + $0x70] sm:$0xff]  ;;  %v1053_v23 = vld [vmem:[#allocation7 + $0x60] sm:$0xff]  ;;  %s1229_s2 = smov [#allocation10]   ;;  %s786_s13 = sshll.u32 %s1326_s4, 4  ;;  %s787_s13 = int_to_ptr.hbm [resolvable:$true] %s786_s13 }
  0x29   :  { %913 = vmatmul.msk.bf16.vlgmr.msra.gmra.mxu1 %vm246_vm0, %v1270_v31  ;;  %v824_v20 = vor.u32 %v1017_v18, %v821_v19  ;;  %v1054_v22 = vld [vmem:[#allocation7 + $0x68] sm:$0xff]  ;;  %v1064_v24 = vld [vmem:[#allocation7 + $0xb8] sm:$0xff]  ;;  %v1063_v26 = vld [vmem:[#allocation7 + $0xb0] sm:$0xff]  ;;  %s784_s3 = sshll.u32 %s1229_s2, 4  ;;  %s785_s3 = int_to_ptr.vmem [resolvable:$true] %s784_s3 }
  0x2a   :  { %316 = vmatpush.bf16.msra.mxu3 %v896_v60  ;;  %v1052_v25 = vld [vmem:[#allocation7 + $0x58] sm:$0xff]  ;;  %v1051_v28 = vld [vmem:[#allocation7 + $0x50] sm:$0xff]  ;;  %v1062_v29 = vld [vmem:[#allocation7 + $0xa8] sm:$0xff] }
  0x2b   :  { %v1048_v27 = vld [vmem:[#allocation7 + $0x38] sm:$0xff]  ;;  %v1047_v30 = vld [vmem:[#allocation7 + $0x30] sm:$0xff]  ;;  %v1061_v32 = vld [vmem:[#allocation7 + $0xa0] sm:$0xff] }
  0x2c   :  { %258 = vmatpush.bf16.msra.mxu0 %v836_v35  ;;  %294 = vmatpush.bf16.msra.mxu2 %v856_v1  ;;  %v1046_v33 = vld [vmem:[#allocation7 + $0x28] sm:$0xff]  ;;  %v1049_v34 = vld [vmem:[#allocation7 + $0x40] sm:$0xff]  ;;  %v1060_v35 = vld [vmem:[#allocation7 + $0x98] sm:$0xff] }
  0x2d   :  { %697 = vmatpush.bf16.msrb.mxu1 %v1048_v27  ;;  %v1045_v36 = vld [vmem:[#allocation7 + $0x20] sm:$0xff]  ;;  %v1059_v37 = vld [vmem:[#allocation7 + $0x90] sm:$0xff]  ;;  %v1044_v39 = vld [vmem:[#allocation7 + $0x18] sm:$0xff] }
  0x2e   :  { %317 = vmatpush.bf16.msra.mxu3 %v888_v5  ;;  %v1058_v40 = vld [vmem:[#allocation7 + $0x88] sm:$0xff]  ;;  %v1278_v41 = vld [vmem:[#allocation8] sm:$0x3f]  ;;  %v1043_v42 = vld [vmem:[#allocation7 + $0x10] sm:$0xff] }
  0x2f   :  { %v1057_v43 = vld [vmem:[#allocation7 + $0x80] sm:$0xff]  ;;  %v330_v44 = vperm.slane %v1278_v41, 0  ;;  %v1042_v47 = vld [vmem:[#allocation7 + $0x8] sm:$0xff]  ;;  %v335_v49 = vperm.slane %v1278_v41, 1 }
  0x30   :  { %259 = vmatpush.bf16.msra.mxu0 %v828_v48  ;;  %295 = vmatpush.bf16.msra.mxu2 %v848_v7  ;;  %v1041_v51 = vld [vmem:[#allocation7] sm:$0xff] }
  0x31   :  { %915 = vmatmul.msk.bf16.vlgmr.msra.gmra.mxu3 %vm246_vm0, %v1270_v31  ;;  %v1050_v31 = vld [vmem:[#allocation7 + $0x48] sm:$0xff]  ;;  %698 = vmatpush.bf16.msrb.mxu1 %v1047_v30 }
  0x32   :  { %716 = vmatpush.bf16.msrb.mxu3 %v1056_v17 }
  0x34   :  { %260 = vmatpush.bf16.msra.mxu0 %v820_v57  ;;  %296 = vmatpush.bf16.msra.mxu2 %v840_v10  ;;  %v354_v57 = vlaneseq }
  0x35   :  { %699 = vmatpush.bf16.msrb.mxu1 %v1046_v33 }
  0x36   :  { %717 = vmatpush.bf16.msrb.mxu3 %v1055_v21  ;;  %v1284_v62 = vshrl.u32 %v354_v57, 7 }
  0x37   :  { %261 = vmatmul.bf16.vlgmr.msra.gmra.mxu0 %v804_v2 }
  0x38   :  { %297 = vmatpush.bf16.msra.mxu2 %v832_v13  ;;  %735 = vmatpush.bf16.msrb.mxu0 %v1064_v24  ;;  %vm420_vm1 = vcmp.lt.s32.totalorder %v1284_v62, 7  ;;  %v358_v15 = vadd.s32 24, %v1284_v62  ;;  %vm411_vm3 = vcmp.lt.s32.totalorder %v1284_v62, 1 }
  0x39   :  { %914 = vmatmul.msk.bf16.gmra.mxu1 %vm246_vm0, %v816_v6 }
  0x3a   :  { %718 = vmatpush.bf16.msrb.mxu3 %v1054_v22  ;;  %700 = vmatpush.bf16.msrb.mxu1 %v1045_v36 }
  0x3c   :  { %298 = vmatpush.bf16.msra.mxu2 %v824_v20  ;;  %736 = vmatpush.bf16.msrb.mxu0 %v1063_v26 }
  0x3e   :  { %719 = vmatpush.bf16.msrb.mxu3 %v1053_v23  ;;  %701 = vmatpush.bf16.msrb.mxu1 %v1044_v39  ;;  %v363_v23 = vand.u32 15, %v1284_v62 }
  0x3f   :  { %299 = vmatmul.bf16.vlgmr.msra.gmra.mxu2 %v804_v2  ;;  %v356_v2 = vadd.s32 8, %v1284_v62 }
  0x40   :  { %1076 = vmatpush.bf16.msrb.mxu2 %v1064_v24  ;;  %737 = vmatpush.bf16.msrb.mxu0 %v1062_v29  ;;  %v384_v24 = vand.u32 15, %v358_v15  ;;  %vm425_vm4 = vcmp.eq.s32.totalorder %v363_v23, 0  ;;  %v754_v15 = vperm.slane %v1278_v41, 4 }
  0x41   :  { %916 = vmatmul.msk.bf16.gmra.mxu3 %vm246_vm0, %v816_v6  ;;  %v370_v9 = vand.u32 15, %v356_v2 }
  0x42   :  { %720 = vmatpush.bf16.msrb.mxu3 %v1052_v25  ;;  %702 = vmatpush.bf16.msrb.mxu1 %v1043_v42  ;;  %vm444_vm5 = vcmp.eq.s32.totalorder %v384_v24, 15 }
  0x43   :  { %vm442_vm2 = vcmp.eq.s32.totalorder %v370_v9, 15 }
  0x44   :  { %1077 = vmatpush.bf16.msrb.mxu2 %v1063_v26  ;;  %738 = vmatpush.bf16.msrb.mxu0 %v1061_v32 }
  0x46   :  { %721 = vmatpush.bf16.msrb.mxu3 %v1051_v28  ;;  %703 = vmatpush.bf16.msrb.mxu1 %v1042_v47 }
  0x47   :  { %266 = vmatmul.bf16.gmra.mxu0 %v812_v16 }
  0x48   :  { %1078 = vmatpush.bf16.msrb.mxu2 %v1062_v29  ;;  %739 = vmatpush.bf16.msrb.mxu0 %v1060_v35 }
  0x4a   :  { %722 = vmatpush.bf16.msrb.mxu3 %v1050_v31  ;;  %704 = vmatpush.bf16.msrb.mxu1 %v1041_v51 }
  0x4c   :  { %1079 = vmatpush.bf16.msrb.mxu2 %v1061_v32  ;;  %740 = vmatpush.bf16.msrb.mxu0 %v1059_v37 }
  0x4e   :  { %723 = vmatpush.bf16.msrb.mxu3 %v1049_v34 }
  0x4f   :  { %304 = vmatmul.bf16.gmra.mxu2 %v812_v16 }
  0x50   :  { %1080 = vmatpush.bf16.msrb.mxu2 %v1060_v35  ;;  %741 = vmatpush.bf16.msrb.mxu0 %v1058_v40 }
  0x54   :  { %1081 = vmatpush.bf16.msrb.mxu2 %v1059_v37  ;;  %742 = vmatpush.bf16.msrb.mxu0 %v1057_v43 }
  0x58   :  { %1082 = vmatpush.bf16.msrb.mxu2 %v1058_v40 }
  0x5c   :  { %1083 = vmatpush.bf16.msrb.mxu2 %v1057_v43 }
  0xa6   :  { %v281_v38 = vpop.f32.mrf.mxu1 }
  0xae   :  { %v283_v50 = vpop.f32.mrf.mxu1 }
  0xb4   :  { %v262_v45 = vpop.f32.mrf.mxu0 }
  0xb5   :  { %v282_v46 = vadd.f32 %v281_v38, %v262_v45 }
  0xb6   :  { %v286_v59 = vpop.f32.mrf.mxu1 }
  0xb7   :  { %v331_v48 = vmul.f32 %v330_v44, %v282_v46 }
  0xb9   :  { %v336_v52 = vadd.f32 %v335_v49, %v331_v48 }
  0xbb   :  { %v340_v55 = vmax.f32 %v336_v52, 0.0 }
  0xbc   :  { %v264_v53 = vpop.f32.mrf.mxu0 }
  0xbd   :  { %v284_v54 = vadd.f32 %v283_v50, %v264_v53  ;;  %v461_v61 = vpack.c.bf16 %v340_v55, %v340_v55  ;;  %v416_v10 = vrot.slane %v340_v55, 1  ;;  %v407_v25 = vrot.slane %v340_v55, 7 }
  0xbe   :  { %v288_v12 = vpop.f32.mrf.mxu1  ;;  %v357_v50 = vadd.s32 16, %v1284_v62 }
  0xbf   :  { %v332_v56 = vmul.f32 %v330_v44, %v284_v54  ;;  %v485_v4 = vunpack.c.l.b16 %v461_v61 }
  0xc0   :  { %v377_v57 = vand.u32 15, %v357_v50 }
  0xc1   :  { %v337_v58 = vadd.f32 %v335_v49, %v332_v56 }
  0xc2   :  { %vm427_vm6 = vcmp.eq.s32.totalorder %v377_v57, 0 }
  0xc3   :  { %v1282_v60 = vmax.f32 %v337_v58, 0.0 }
  0xc4   :  { %v267_v63 = vpop.f32.mrf.mxu0 }
  0xc5   :  { %v287_v0 = vadd.f32 %v286_v59, %v267_v63  ;;  %v462_v1 = vpack.c.bf16 %v1282_v60, %v1282_v60  ;;  %v417_v6 = vrot.slane %v1282_v60, 1  ;;  %v408_v18 = vrot.slane %v1282_v60, 7 }
  0xc7   :  { %v333_v3 = vmul.f32 %v330_v44, %v287_v0  ;;  %v486_v5 = vunpack.c.l.b16 %v462_v1  ;;  %v423_v14 = vsel %vm420_vm1, %v416_v10, %v417_v6  ;;  %v414_v32 = vsel %vm411_vm3, %v407_v25, %v408_v18 }
  0xc8   :  { %v465_v21 = vpack.c.bf16 %v423_v14, %v423_v14  ;;  %v458_v38 = vpack.c.bf16 %v414_v32, %v414_v32 }
  0xc9   :  { %v338_v7 = vadd.f32 %v335_v49, %v333_v3  ;;  %v489_v8 = vpack.c.b16 %v486_v5, %v485_v4  ;;  %v319_v4 = vpop.f32.mrf.mxu3 }
  0xca   :  { %v497_v30 = vunpack.c.l.b16 %v465_v21  ;;  %v474_v53 = vunpack.c.l.b16 %v458_v38  ;;  %v759_v21 = vperm.slane %v1278_v41, 5 }
  0xcb   :  { %v342_v11 = vmax.f32 %v338_v7, 0.0  ;;  %724 = vmatmul.bf16.vlgmr.msrb.gmra.mxu3 %v489_v8  ;;  %v300_v7 = vpop.f32.mrf.mxu2 }
  0xcc   :  { %v269_v13 = vpop.f32.mrf.mxu0 }
  0xcd   :  { %v418_v16 = vrot.slane %v342_v11, 1  ;;  %v289_v17 = vadd.f32 %v288_v12, %v269_v13  ;;  %v463_v28 = vpack.c.bf16 %v342_v11, %v342_v11  ;;  %v409_v58 = vrot.slane %v342_v11, 7 }
  0xcf   :  { %v334_v19 = vmul.f32 %v330_v44, %v289_v17  ;;  %v422_v20 = vsel %vm420_vm1, %v417_v6, %v418_v16  ;;  %v487_v37 = vunpack.c.l.b16 %v463_v28  ;;  %v413_v59 = vsel %vm411_vm3, %v408_v18, %v409_v58 }
  0xd0   :  { %v454_v22 = vsel %vm442_vm2, 0.0, %v422_v20  ;;  %v439_v61 = vsel %vm427_vm6, 0.0, %v413_v59  ;;  %v320_v17 = vadd.f32 %v319_v4, %v300_v7  ;;  %v344_v18 = vperm.slane %v1278_v41, 2 }
  0xd1   :  { %v339_v26 = vadd.f32 %v335_v49, %v334_v19  ;;  %v466_v27 = vpack.c.bf16 %v454_v22, %v454_v22  ;;  %v459_v0 = vpack.c.bf16 %v439_v61, %v439_v61  ;;  %v321_v5 = vpop.f32.mrf.mxu3 }
  0xd2   :  { %v345_v24 = vmul.f32 %v344_v18, %v320_v17 }
  0xd3   :  { %v343_v29 = vmax.f32 %v339_v26, 0.0  ;;  %v498_v31 = vunpack.c.l.b16 %v466_v27  ;;  %v475_v2 = vunpack.c.l.b16 %v459_v0  ;;  %v302_v9 = vpop.f32.mrf.mxu2 }
  0xd4   :  { %v322_v19 = vadd.f32 %v321_v5, %v302_v9 }
  0xd5   :  { %v410_v33 = vrot.slane %v343_v29, 7  ;;  %v419_v34 = vrot.slane %v343_v29, 1  ;;  %v501_v35 = vpack.c.b16 %v498_v31, %v497_v30  ;;  %v464_v36 = vpack.c.bf16 %v343_v29, %v343_v29 }
  0xd6   :  { %v346_v28 = vmul.f32 %v344_v18, %v322_v19 }
  0xd7   :  { %743 = vmatmul.bf16.vlgmr.msrb.gmra.mxu0 %v501_v35  ;;  %v488_v39 = vunpack.c.l.b16 %v464_v36  ;;  %v415_v40 = vsel %vm411_vm3, %v410_v33, %v407_v25  ;;  %v421_v42 = vsel %vm420_vm1, %v418_v16, %v419_v34  ;;  %v424_v43 = vsel %vm420_vm1, %v419_v34, %v416_v10 }
  0xd8   :  { %v437_v44 = vsel %vm425_vm4, 0.0, %v415_v40  ;;  %v456_v45 = vsel %vm444_vm5, 0.0, %v424_v43  ;;  %v467_v46 = vpack.c.bf16 %v421_v42, %v421_v42  ;;  %v412_v60 = vsel %vm411_vm3, %v409_v58, %v410_v33 }
  0xd9   :  { %v490_v47 = vpack.c.b16 %v488_v39, %v487_v37  ;;  %v457_v48 = vpack.c.bf16 %v437_v44, %v437_v44  ;;  %v468_v49 = vpack.c.bf16 %v456_v45, %v456_v45  ;;  %v460_v63 = vpack.c.bf16 %v412_v60, %v412_v60  ;;  %v324_v6 = vpop.f32.mrf.mxu3 }
  0xda   :  { %v499_v51 = vunpack.c.l.b16 %v467_v46  ;;  %v349_v25 = vperm.slane %v1278_v41, 3 }
  0xdb   :  { %729 = vmatmul.bf16.gmra.mxu3 %v490_v47  ;;  %v473_v52 = vunpack.c.l.b16 %v457_v48  ;;  %v500_v54 = vunpack.c.l.b16 %v468_v49  ;;  %v476_v1 = vunpack.c.l.b16 %v460_v63  ;;  %v305_v11 = vpop.f32.mrf.mxu2 }
  0xdc   :  { %v350_v31 = vadd.f32 %v349_v25, %v345_v24  ;;  %v351_v34 = vadd.f32 %v349_v25, %v346_v28  ;;  %v325_v45 = vadd.f32 %v324_v6, %v305_v11 }
  0xdd   :  { %v477_v55 = vpack.c.b16 %v474_v53, %v473_v52  ;;  %v502_v56 = vpack.c.b16 %v500_v54, %v499_v51  ;;  %v478_v3 = vpack.c.b16 %v476_v1, %v475_v2 }
  0xde   :  { %v347_v50 = vmul.f32 %v344_v18, %v325_v45 }
  0xdf   :  { %705 = vmatmul.bf16.vlgmr.msrb.gmra.mxu1 %v477_v55  ;;  %748 = vmatmul.bf16.vlgmr.msrb.gmra.mxu2 %v502_v56 }
  0xe0   :  { %v352_v56 = vadd.f32 %v349_v25, %v347_v50 }
  0xe1   :  { %v326_v8 = vpop.f32.mrf.mxu3 }
  0xe3   :  { %v307_v22 = vpop.f32.mrf.mxu2 }
  0xe4   :  { %v327_v46 = vadd.f32 %v326_v8, %v307_v22 }
  0xe6   :  { %v348_v53 = vmul.f32 %v344_v18, %v327_v46 }
  0xe8   :  { %v353_v58 = vadd.f32 %v349_v25, %v348_v53 }
  0xef   :  { %710 = vmatmul.bf16.gmra.mxu1 %v478_v3 }
 0x14e   :  { %v725_v10 = vpop.f32.mrf.mxu3 }
 0x154   :  { %v744_v12 = vpop.f32.mrf.mxu0 }
 0x156   :  { %v727_v16 = vpop.f32.mrf.mxu3 }
 0x15c   :  { %v706_v13 = vpop.f32.mrf.mxu1  ;;  %v746_v27 = vpop.f32.mrf.mxu0 }
 0x15d   :  { %v726_v14 = vadd.f32 %v725_v10, %v706_v13 }
 0x15e   :  { %v730_v33 = vpop.f32.mrf.mxu3 }
 0x15f   :  { %v745_v62 = vadd.f32 %v744_v12, %v726_v14 }
 0x161   :  { %v755_v20 = vmul.f32 %v754_v15, %v745_v62 }
 0x162   :  { %v749_v37 = vpop.f32.mrf.mxu2 }
 0x163   :  { %v760_v29 = vadd.f32 %v759_v21, %v755_v20 }
 0x164   :  { %v708_v23 = vpop.f32.mrf.mxu1 }
 0x165   :  { %v728_v26 = vadd.f32 %v727_v16, %v708_v23  ;;  %v764_v35 = vadd.f32 %v760_v29, %v350_v31 }
 0x166   :  { %v732_v48 = vpop.f32.mrf.mxu3 }
 0x167   :  { %v747_v30 = vadd.f32 %v746_v27, %v728_v26  ;;  %v768_v42 = vmax.f32 %v764_v35, 0.0 }
 0x169   :  { %v756_v32 = vmul.f32 %v754_v15, %v747_v30 }
 0x16a   :  { %v751_v52 = vpop.f32.mrf.mxu2 }
 0x16b   :  { %v761_v36 = vadd.f32 %v759_v21, %v756_v32 }
 0x16c   :  { %v711_v38 = vpop.f32.mrf.mxu1 }
 0x16d   :  { %v765_v39 = vadd.f32 %v761_v36, %v351_v34  ;;  %v731_v40 = vadd.f32 %v730_v33, %v711_v38 }
 0x16f   :  { %v769_v43 = vmax.f32 %v765_v39, 0.0  ;;  %v750_v44 = vadd.f32 %v749_v37, %v731_v40 }
 0x171   :  { %v1068_v41 = vpack.c.bf16 %v769_v43, %v768_v42  ;;  %v757_v47 = vmul.f32 %v754_v15, %v750_v44 }
 0x173   :  { %1069 = vst [vmem:[#allocation10] sm:$0xff] %v1068_v41   ;;  %v762_v54 = vadd.f32 %v759_v21, %v757_v47 }
 0x174   :  { %v713_v49 = vpop.f32.mrf.mxu1 }
 0x175   :  { %v733_v51 = vadd.f32 %v732_v48, %v713_v49  ;;  %v766_v59 = vadd.f32 %v762_v54, %v352_v56 }
 0x177   :  { %v752_v55 = vadd.f32 %v751_v52, %v733_v51  ;;  %v770_v63 = vmax.f32 %v766_v59, 0.0 }
 0x179   :  { %v758_v57 = vmul.f32 %v754_v15, %v752_v55 }
 0x17b   :  { %v763_v60 = vadd.f32 %v759_v21, %v758_v57 }
 0x17d   :  { %v767_v61 = vadd.f32 %v763_v60, %v353_v58 }
 0x17f   :  { %v771_v0 = vmax.f32 %v767_v61, 0.0 }
 0x181   :  { %v1073_v1 = vpack.c.bf16 %v771_v0, %v770_v63 }
 0x183   :  { %1075 = vst [vmem:[#allocation10 + $0x8] sm:$0xff] %v1073_v1  }
 0x184   :  { %792 = dma.vmem_to_hbm [thread:$0]  %s785_s3, 256, %s787_s13, [#allocation4], %s1226_s7, %s1226_s7, %s1227_s8  }
 0x185   :  { %1219 = dma.done.wait [#allocation4], 256  }
 0x186   :  { %1220 = vsyncadd [#allocation4], 4294967040 }
 0x187   :  { %797 = vsyncpa [#allocation3], 1 }
 0x188   :  { %798 = vsyncpa [#allocation6], 1 }
 0x189   :  { %799 = vsyncpa [#allocation9], 1 }
 0x18a   :  { %800 = vsyncpa [#allocation4], 1 }

</bundles_post_ra>
